<compile_context>
chip_gen: v5e
topology: v5e:2x2
jax: 0.10.0
libtpu: 0.0.40
codegen_flags: <defaults>
</compile_context>

<pallas_src>
import functools

import jax
import jax.numpy as jnp
from jax.experimental import pallas as pl
from jax.experimental.pallas import tpu as pltpu


def _round_up(x, m):
    return (x + m - 1) // m * m


def _pick_tf(f_pad, target):
    """Largest multiple of 128 that divides f_pad and is <= target (min 128)."""
    q = f_pad // 128
    best = 128
    for d in range(1, q + 1):
        if q % d == 0 and 128 * d <= target:
            best = 128 * d
    return best


def _vmem_budget_bytes():
    """Generation-aware scoped-VMEM budget (leave compiler headroom)."""
    cap = None
    try:
        cap = getattr(pltpu.get_tpu_info(), "vmem_capacity_bytes", None)
    except Exception:
        cap = None
    if cap is None:
        cap = 64 << 20                 # unknown chip: assume v7x-like 64 MiB/TC
    if cap <= (64 << 20):
        return 48 << 20                # v7x: keep spill / internal-scratch headroom
    return 100 << 20                   # v5e / v6e: 128 MiB physical, ~100 MiB usable


def _apply_activation(h, activation):
    if activation == "ReLU":
        return jnp.maximum(h, 0.0)
    if activation == "LeakyReLU":
        return jnp.where(h >= 0.0, h, 0.01 * h)
    if activation == "GeLU":
        # tanh approximation (EUP-friendly inside the kernel).
        # TODO(synk): torch nn.GELU defaults to the exact erf form.
        return jax.nn.gelu(h, approximate=True)
    raise ValueError("Unsupported activation type: " + str(activation))


# ---------------------------------------------------------------------------
# Kernels
# ---------------------------------------------------------------------------

def ffn_fused_kernel(x_ref, w1_ref, b1_ref, w2_ref, b2_ref, o_ref, *, activation):
    # Weights fully VMEM-resident: one grid step = one row tile, both matmuls.
    h = jnp.dot(x_ref[...], w1_ref[...], preferred_element_type=jnp.float32)
    h = _apply_activation(h + b1_ref[...], activation)
    out = jnp.dot(h.astype(w2_ref.dtype), w2_ref[...],
                  preferred_element_type=jnp.float32)
    o_ref[...] = (out + b2_ref[...]).astype(o_ref.dtype)


def ffn_tiled_kernel_f32out(x_ref, w1_ref, b1_ref, w2_ref, b2_ref, o_ref, *,
                            activation):
    # Hidden (F) axis tiled; o_ref (f32) doubles as the accumulator — it is
    # resident across k because its index_map ignores k — so no scratch.
    k = pl.program_id(1)
    h = jnp.dot(x_ref[...], w1_ref[...], preferred_element_type=jnp.float32)
    h = _apply_activation(h + b1_ref[...], activation)
    p = jnp.dot(h.astype(w2_ref.dtype), w2_ref[...],
                preferred_element_type=jnp.float32)

    @pl.when(k == 0)
    def _():
        o_ref[...] = p

    @pl.when(k > 0)
    def _():
        o_ref[...] += p

    @pl.when(k == pl.num_programs(1) - 1)
    def _():
        o_ref[...] += b2_ref[...]


def ffn_tiled_kernel_acc(x_ref, w1_ref, b1_ref, w2_ref, b2_ref, o_ref, acc_ref,
                         *, activation):
    # Same as above, but with an explicit f32 scratch accumulator for narrow
    # output dtypes (e.g. bf16).
    k = pl.program_id(1)

    @pl.when(k == 0)
    def _():
        acc_ref[...] = jnp.zeros_like(acc_ref)

    h = jnp.dot(x_ref[...], w1_ref[...], preferred_element_type=jnp.float32)
    h = _apply_activation(h + b1_ref[...], activation)
    acc_ref[...] += jnp.dot(h.astype(w2_ref.dtype), w2_ref[...],
                            preferred_element_type=jnp.float32)

    @pl.when(k == pl.num_programs(1) - 1)
    def _():
        o_ref[...] = (acc_ref[...] + b2_ref[...]).astype(o_ref.dtype)


# ---------------------------------------------------------------------------
# Wrappers
# ---------------------------------------------------------------------------

def prepare_ffn_params(w1, b1, w2, b2, *, compute_dtype=None):
    """One-time weight preprocessing (transpose / pad / cast).

    Layouts follow torch.nn.Linear: w1: (F, E), b1: (F,), w2: (E, F), b2: (E,).
    Call once at model setup and reuse with feed_forward_prepared(); doing it
    per forward re-streams both weight matrices through HBM for nothing.
    compute_dtype=jnp.bfloat16 is recommended on v5e/v6e/v7x (f32 accumulation
    is kept inside the kernel regardless).
    """
    F, E = w1.shape
    w1 = jnp.asarray(w1)
    cdt = jnp.dtype(compute_dtype) if compute_dtype is not None else jnp.dtype(w1.dtype)
    E_pad = _round_up(E, 128)
    F_pad = _round_up(F, 128)
    w1t = jnp.pad(w1.T.astype(cdt), ((0, E_pad - E), (0, F_pad - F)))          # (E_pad, F_pad)
    w2t = jnp.pad(jnp.asarray(w2).T.astype(cdt), ((0, F_pad - F), (0, E_pad - E)))  # (F_pad, E_pad)
    b1r = jnp.pad(jnp.asarray(b1).astype(jnp.float32).reshape(1, F),
                  ((0, 0), (0, F_pad - F)))
    b2r = jnp.pad(jnp.asarray(b2).astype(jnp.float32).reshape(1, E),
                  ((0, 0), (0, E_pad - E)))
    return dict(E=E, F=F, E_pad=E_pad, F_pad=F_pad, cdt=cdt,
                w1t=w1t, b1r=b1r, w2t=w2t, b2r=b2r)


def feed_forward_prepared(x, params, *, tm=256, tf=1024, activation="ReLU",
                          force_tiled=False):
    """x: (B, N, E); params: output of prepare_ffn_params()."""
    B, N, E = x.shape
    assert E == params["E"], "embed_dim mismatch between x and prepared weights"
    E_pad, F_pad = params["E_pad"], params["F_pad"]
    cdt = params["cdt"]
    w1t, b1r, w2t, b2r = params["w1t"], params["b1r"], params["w2t"], params["b2r"]

    out_dtype = x.dtype
    M = B * N
    isz = jnp.dtype(cdt).itemsize
    osz = jnp.dtype(out_dtype).itemsize
    budget = _vmem_budget_bytes()

    # Row tile: capped by (padded) M; keep >= 128 rows when possible, and split
    # into >= 2 tiles when there are enough rows so the "parallel" M axis can
    # feed both TensorCores on v7x (harmless on single-TC v5e/v6e).
    tm_eff = min(tm, _round_up(M, 8))
    if M >= 256:
        tm_eff = min(tm_eff, max(128, _round_up((M + 1) // 2, 8)))

    flops = 4 * M * E_pad * F_pad  # two matmuls

    # ---- fast path feasibility: both weight matrices resident in VMEM ----
    fast_need = (2 * tm_eff * E_pad * isz          # x tile (double-buffered)
                 + 2 * tm_eff * E_pad * osz        # out tile (double-buffered)
                 + 2 * 2 * E_pad * F_pad * isz     # W1^T + W2^T (2 bufs each)
                 + 2 * 2 * (E_pad + F_pad) * 4     # biases
                 + tm_eff * F_pad * 4              # hidden activation (f32)
                 + (2 << 20))                      # compiler headroom
    use_fast = (not force_tiled) and (fast_need <= budget)

    if use_fast:
        tm_use = tm_eff
        M_pad = _round_up(M, tm_use)
        x2 = jnp.pad(x.reshape(M, E).astype(cdt),
                     ((0, M_pad - M), (0, E_pad - E)))
        bytes_accessed = (M_pad * E_pad * (isz + osz)
                          + 2 * E_pad * F_pad * isz + (E_pad + F_pad) * 4)
        vmem_limit = int(min(budget, max(fast_need + (4 << 20), 32 << 20)))

        out2 = pl.pallas_call(
            functools.partial(ffn_fused_kernel, activation=activation),
            out_shape=jax.ShapeDtypeStruct((M_pad, E_pad), out_dtype),
            grid_spec=pltpu.PrefetchScalarGridSpec(
                num_scalar_prefetch=0,
                grid=(M_pad // tm_use,),
                in_specs=[
                    pl.BlockSpec((tm_use, E_pad), lambda i: (i, 0)),   # x tile
                    pl.BlockSpec((E_pad, F_pad), lambda i: (0, 0)),    # W1^T (resident)
                    pl.BlockSpec((1, F_pad), lambda i: (0, 0)),        # b1 (resident)
                    pl.BlockSpec((F_pad, E_pad), lambda i: (0, 0)),    # W2^T (resident)
                    pl.BlockSpec((1, E_pad), lambda i: (0, 0)),        # b2 (resident)
                ],
                out_specs=pl.BlockSpec((tm_use, E_pad), lambda i: (i, 0)),
            ),
            compiler_params=pltpu.CompilerParams(
                dimension_semantics=("parallel",),
                vmem_limit_bytes=vmem_limit),
            cost_estimate=pl.CostEstimate(flops=int(flops), transcendentals=0,
                                          bytes_accessed=int(bytes_accessed)),
        )(x2, w1t, b1r, w2t, b2r)
        return out2[:M, :E].reshape(B, N, E)

    # ---- fallback: hidden (F) axis tiled on an "arbitrary" reduction axis ----
    # Weight HBM traffic scales as (M_pad/tm) * 2*E*F, so prefer the largest
    # row tile; shrink tf first, then tm, until the VMEM estimate fits.
    tm_use = min(max(tm, 512), _round_up(M, 8))
    tf_use = _pick_tf(F_pad, tf)

    def _tiled_need(tm_, tf_):
        return (2 * tm_ * E_pad * isz              # x tile (resident over k)
                + 2 * tm_ * E_pad * osz            # out tile
                + 2 * 2 * E_pad * tf_ * isz        # W1^T / W2^T slices
                + 2 * 2 * (tf_ + E_pad) * 4        # bias slices
                + tm_ * E_pad * 4                  # f32 accumulator (worst case)
                + tm_ * tf_ * 4                    # hidden slice
                + (2 << 20))

    while _tiled_need(tm_use, tf_use) > budget and tf_use > 128:
        tf_use = _pick_tf(F_pad, tf_use // 2)
    while _tiled_need(tm_use, tf_use) > budget and tm_use > 128:
        tm_use = max(128, _round_up(tm_use // 2, 8))

    M_pad = _round_up(M, tm_use)
    x2 = jnp.pad(x.reshape(M, E).astype(cdt), ((0, M_pad - M), (0, E_pad - E)))
    num_m_tiles = M_pad // tm_use
    bytes_accessed = (M_pad * E_pad * (isz + osz)
                      + num_m_tiles * 2 * E_pad * F_pad * isz
                      + (E_pad + F_pad) * 4)
    vmem_limit = int(min(budget,
                         max(_tiled_need(tm_use, tf_use) + (4 << 20), 32 << 20)))

    if jnp.dtype(out_dtype) == jnp.float32:
        # Accumulate directly into the (resident) f32 output block: no scratch.
        kernel = functools.partial(ffn_tiled_kernel_f32out, activation=activation)
        scratch = []
    else:
        kernel = functools.partial(ffn_tiled_kernel_acc, activation=activation)
        scratch = [pltpu.VMEM((tm_use, E_pad), jnp.float32)]

    out2 = pl.pallas_call(
        kernel,
        out_shape=jax.ShapeDtypeStruct((M_pad, E_pad), out_dtype),
        grid_spec=pltpu.PrefetchScalarGridSpec(
            num_scalar_prefetch=0,
            grid=(M_pad // tm_use, F_pad // tf_use),
            in_specs=[
                pl.BlockSpec((tm_use, E_pad), lambda i, k: (i, 0)),   # x (resident over k)
                pl.BlockSpec((E_pad, tf_use), lambda i, k: (0, k)),   # W1^T slice
                pl.BlockSpec((1, tf_use), lambda i, k: (0, k)),       # b1 slice
                pl.BlockSpec((tf_use, E_pad), lambda i, k: (k, 0)),   # W2^T slice
                pl.BlockSpec((1, E_pad), lambda i, k: (0, 0)),        # b2
            ],
            out_specs=pl.BlockSpec((tm_use, E_pad), lambda i, k: (i, 0)),
            scratch_shapes=scratch,
        ),
        compiler_params=pltpu.CompilerParams(
            dimension_semantics=("parallel", "arbitrary"),
            vmem_limit_bytes=vmem_limit),
        cost_estimate=pl.CostEstimate(flops=int(flops), transcendentals=0,
                                      bytes_accessed=int(bytes_accessed)),
    )(x2, w1t, b1r, w2t, b2r)
    return out2[:M, :E].reshape(B, N, E)


def feed_forward(x, w1, b1, w2, b2, *, tm=256, tf=1024, compute_dtype=None,
                 activation="ReLU", force_tiled=False):
    """Convenience wrapper (prepares weights on every call).

    For production, call prepare_ffn_params() once at setup and reuse
    feed_forward_prepared() so the transpose/pad/cast traffic is not paid per
    forward pass.
    """
    params = prepare_ffn_params(w1, b1, w2, b2, compute_dtype=compute_dtype)
    return feed_forward_prepared(x, params, tm=tm, tf=tf, activation=activation,
                                 force_tiled=force_tiled)


if __name__ == "__main__":
    # Small shapes consistent with the module: (B, N, embed_dim), hidden ff_dim.
    B, N, embed_dim, ff_dim = 2, 8, 32, 64

    key = jax.random.PRNGKey(0)
    kx, kw1, kb1, kw2, kb2 = jax.random.split(key, 5)

    x = jax.random.normal(kx, (B, N, embed_dim), dtype=jnp.float32)

    # Deterministic PyTorch-style uniform(-1/sqrt(fan_in), 1/sqrt(fan_in)) init.
    bound1 = 1.0 / (embed_dim ** 0.5)
    w1 = jax.random.uniform(kw1, (ff_dim, embed_dim), minval=-bound1, maxval=bound1)
    b1 = jax.random.uniform(kb1, (ff_dim,), minval=-bound1, maxval=bound1)
    bound2 = 1.0 / (ff_dim ** 0.5)
    w2 = jax.random.uniform(kw2, (embed_dim, ff_dim), minval=-bound2, maxval=bound2)
    b2 = jax.random.uniform(kb2, (embed_dim,), minval=-bound2, maxval=bound2)

    # Pure-JAX reference: linear2(ReLU(linear1(x))).
    ref = jnp.maximum(x @ w1.T + b1, 0.0) @ w2.T + b2

    # 1) f32, weights-resident fast path (weights prepared once, reused).
    params_f32 = prepare_ffn_params(w1, b1, w2, b2)
    out = jax.block_until_ready(feed_forward_prepared(x, params_f32))
    assert out.shape == (B, N, embed_dim)
    assert jnp.allclose(out, ref, atol=1e-5, rtol=1e-5)

    # 2) Non-divisible row count (padding path), reusing the prepared weights.
    x_odd = jax.random.normal(kx, (B, 9, embed_dim), dtype=jnp.float32)
    ref_odd = jnp.maximum(x_odd @ w1.T + b1, 0.0) @ w2.T + b2
    out_odd = jax.block_until_ready(feed_forward_prepared(x_odd, params_f32))
    assert out_odd.shape == (B, 9, embed_dim)
    assert jnp.allclose(out_odd, ref_odd, atol=1e-5, rtol=1e-5)

    # 3) bf16 compute path (f32 accumulation) — looser tolerance.
    out_bf16 = jax.block_until_ready(
        feed_forward(x, w1, b1, w2, b2, compute_dtype=jnp.bfloat16))
    assert jnp.allclose(out_bf16, ref, atol=1e-1, rtol=1e-1)

    # 4) Forced F-tiled fallback, f32 output (accumulates directly into o_ref).
    out_tiled = jax.block_until_ready(
        feed_forward(x, w1, b1, w2, b2, force_tiled=True))
    assert jnp.allclose(out_tiled, ref, atol=1e-5, rtol=1e-5)

    # 5) Forced F-tiled fallback, bf16 in/out (f32 scratch-accumulator variant).
    x_bf16 = x.astype(jnp.bfloat16)
    out_tiled_bf16 = jax.block_until_ready(
        feed_forward(x_bf16, w1, b1, w2, b2, compute_dtype=jnp.bfloat16,
                     force_tiled=True))
    assert out_tiled_bf16.dtype == jnp.bfloat16
    assert jnp.allclose(out_tiled_bf16.astype(jnp.float32), ref,
                        atol=1.5e-1, rtol=1.5e-1)

    # 6) GeLU activation option (tanh approximation, matched in the reference).
    ref_gelu = jax.nn.gelu(x @ w1.T + b1, approximate=True) @ w2.T + b2
    out_gelu = jax.block_until_ready(
        feed_forward_prepared(x, params_f32, activation="GeLU"))
    assert jnp.allclose(out_gelu, ref_gelu, atol=1e-3, rtol=1e-3)

    print("KERNEL_OK")
</pallas_src>

<mosaic_0001>
module attributes {stable_mosaic.version = 11 : i64} {
  func.func @ffn_fused_kernel(%arg0: i32, %arg1: memref<16x128xf32, #tpu.memory_space<vmem>>, %arg2: memref<128x128xf32, #tpu.memory_space<vmem>>, %arg3: memref<1x128xf32, #tpu.memory_space<vmem>>, %arg4: memref<128x128xf32, #tpu.memory_space<vmem>>, %arg5: memref<1x128xf32, #tpu.memory_space<vmem>>, %arg6: memref<16x128xf32, #tpu.memory_space<vmem>>) attributes {dimension_semantics = [#tpu.dimension_semantics<parallel>], iteration_bounds = array<i64: 1>, scalar_prefetch = 0 : i64, scratch_operands = 0 : i64, tpu.core_type = #tpu.core_type<tc>, window_params = [{transform_indices = @transform_0, window_bounds = array<i64: 16, 128>}, {pipeline_mode = #tpu.pipeline_mode<synchronous>, transform_indices = @transform_1, window_bounds = array<i64: 128, 128>}, {pipeline_mode = #tpu.pipeline_mode<synchronous>, transform_indices = @transform_2, window_bounds = array<i64: 1, 128>}, {pipeline_mode = #tpu.pipeline_mode<synchronous>, transform_indices = @transform_3, window_bounds = array<i64: 128, 128>}, {pipeline_mode = #tpu.pipeline_mode<synchronous>, transform_indices = @transform_4, window_bounds = array<i64: 1, 128>}, {transform_indices = @transform_5, window_bounds = array<i64: 16, 128>}]} {
    %c0 = arith.constant 0 : index
    %c0_0 = arith.constant 0 : index
    %0 = vector.load %arg1[%c0, %c0_0] : memref<16x128xf32, #tpu.memory_space<vmem>>, vector<16x128xf32>
    %c0_1 = arith.constant 0 : index
    %c0_2 = arith.constant 0 : index
    %1 = vector.load %arg2[%c0_1, %c0_2] : memref<128x128xf32, #tpu.memory_space<vmem>>, vector<128x128xf32>
    %cst = arith.constant dense<0.000000e+00> : vector<16x128xf32>
    %2 = tpu.matmul %0, %1, %cst {dimension_numbers = #tpu.dot_dimension_numbers<[1], [0], [0], [1], [0, 0, 1, 1], [], []>} : vector<16x128xf32>, vector<128x128xf32>, vector<16x128xf32> -> vector<16x128xf32>
    %c0_3 = arith.constant 0 : index
    %c0_4 = arith.constant 0 : index
    %3 = vector.load %arg3[%c0_3, %c0_4] : memref<1x128xf32, #tpu.memory_space<vmem>>, vector<1x128xf32>
    %4 = vector.broadcast %3 : vector<1x128xf32> to vector<16x128xf32>
    %5 = arith.addf %2, %4 : vector<16x128xf32>
    %cst_5 = arith.constant 0.000000e+00 : f32
    %6 = vector.broadcast %cst_5 : f32 to vector<16x128xf32>
    %7 = arith.maximumf %5, %6 : vector<16x128xf32>
    %c0_6 = arith.constant 0 : index
    %c0_7 = arith.constant 0 : index
    %8 = vector.load %arg4[%c0_6, %c0_7] : memref<128x128xf32, #tpu.memory_space<vmem>>, vector<128x128xf32>
    %cst_8 = arith.constant dense<0.000000e+00> : vector<16x128xf32>
    %9 = tpu.matmul %7, %8, %cst_8 {dimension_numbers = #tpu.dot_dimension_numbers<[1], [0], [0], [1], [0, 0, 1, 1], [], []>} : vector<16x128xf32>, vector<128x128xf32>, vector<16x128xf32> -> vector<16x128xf32>
    %c0_9 = arith.constant 0 : index
    %c0_10 = arith.constant 0 : index
    %10 = vector.load %arg5[%c0_9, %c0_10] : memref<1x128xf32, #tpu.memory_space<vmem>>, vector<1x128xf32>
    %11 = vector.broadcast %10 : vector<1x128xf32> to vector<16x128xf32>
    %12 = arith.addf %9, %11 : vector<16x128xf32>
    %c0_11 = arith.constant 0 : index
    %c0_12 = arith.constant 0 : index
    %13 = vector.load %arg6[%c0_11, %c0_12] : memref<16x128xf32, #tpu.memory_space<vmem>>, vector<16x128xf32>
    tpu.vector_store %arg6[%c0_11, %c0_12], %12 {strides = array<i32>} : memref<16x128xf32, #tpu.memory_space<vmem>>, vector<16x128xf32>,
    return
  }
  func.func @transform_0(%arg0: i32) -> (i32, i32) {
    %c0_i32 = arith.constant 0 : i32
    %c0_i32_0 = arith.constant 0 : i32
    return %arg0, %c0_i32 : i32, i32
  }
  func.func @transform_1(%arg0: i32) -> (i32, i32) {
    %c0_i32 = arith.constant 0 : i32
    %c0_i32_0 = arith.constant 0 : i32
    %c0_i32_1 = arith.constant 0 : i32
    return %c0_i32, %c0_i32_0 : i32, i32
  }
  func.func @transform_2(%arg0: i32) -> (i32, i32) {
    %c0_i32 = arith.constant 0 : i32
    %c0_i32_0 = arith.constant 0 : i32
    %c0_i32_1 = arith.constant 0 : i32
    return %c0_i32, %c0_i32_0 : i32, i32
  }
  func.func @transform_3(%arg0: i32) -> (i32, i32) {
    %c0_i32 = arith.constant 0 : i32
    %c0_i32_0 = arith.constant 0 : i32
    %c0_i32_1 = arith.constant 0 : i32
    return %c0_i32, %c0_i32_0 : i32, i32
  }
  func.func @transform_4(%arg0: i32) -> (i32, i32) {
    %c0_i32 = arith.constant 0 : i32
    %c0_i32_0 = arith.constant 0 : i32
    %c0_i32_1 = arith.constant 0 : i32
    return %c0_i32, %c0_i32_0 : i32, i32
  }
  func.func @transform_5(%arg0: i32) -> (i32, i32) {
    %c0_i32 = arith.constant 0 : i32
    %c0_i32_0 = arith.constant 0 : i32
    return %arg0, %c0_i32 : i32, i32
  }
}

</mosaic_0001>

<bundles_post_ra>
// kernel: tpu_custom_call.1
= control target key start
LH: loop header
LB: loop body
LE: loop exit
PB: predicated region body
PF: predicated region fallthrough
CT: control target
= control target key end

     0   :  { %10 = vsyncpa [#allocation3], 0  ;;  %s388_s0 = inlined_call_operand.hbm [shape: f32[16,128], index: 0, kind: input, shape index: {}]   ;;  %s389_s1 = inlined_call_operand.hbm [shape: f32[128,128], index: 1, kind: input, shape index: {}]   ;;  %s390_s2 = inlined_call_operand.vmem [shape: f32[1,128], index: 2, kind: input, shape index: {}]   ;;  %s391_s3 = inlined_call_operand.hbm [shape: f32[128,128], index: 3, kind: input, shape index: {}]   ;;  %s392_s4 = inlined_call_operand.vmem [shape: f32[1,128], index: 4, kind: input, shape index: {}]   ;;  %s393_s5 = inlined_call_operand.hbm [shape: f32[16,128], index: 5, kind: output, shape index: {}]  }
   0x1   :  { %11 = vsyncpa [#allocation6], 0 }
   0x2   :  { %12 = vsyncpa [#allocation4], 0  ;;  %s30_s20 = sshll.u32 %s389_s1, 4  ;;  %s322_s21 = smov [#allocation5]   ;;  %s31_s20 = int_to_ptr.hbm [resolvable:$true] %s30_s20 }
   0x3   :  { %s32_s22 = sshll.u32 %s322_s21, 4  ;;  %s17_s25 = sshll.u32 %s388_s0, 4  ;;  %s33_s22 = int_to_ptr.vmem [resolvable:$true] %s32_s22  ;;  %s18_s25 = int_to_ptr.hbm [resolvable:$true] %s17_s25 }
   0x4   :  { %s323_s26 = smov 128   ;;  %s324_s27 = smov 8  }
   0x5   :  { %38 = dma.hbm_to_vmem [thread:$0]  %s31_s20, 2048, %s33_s22, [#allocation6], %s323_s26, %s323_s26, %s324_s27  }
   0x6   :  { %s325_s28 = smov [#allocation2]   ;;  %s45_s1 = sshll.u32 %s391_s3, 4  ;;  %s46_s1 = int_to_ptr.hbm [resolvable:$true] %s45_s1 }
   0x7   :  { %s19_s29 = sshll.u32 %s325_s28, 4  ;;  %s326_s0 = smov [#allocation7]   ;;  %s20_s29 = int_to_ptr.vmem [resolvable:$true] %s19_s29 }
   0x8   :  { %25 = dma.hbm_to_vmem [thread:$0]  %s18_s25, 256, %s20_s29, [#allocation3], %s323_s26, %s323_s26, %s324_s27  }
   0x9   :  { %s47_s7 = sshll.u32 %s326_s0, 4  ;;  %s48_s7 = int_to_ptr.vmem [resolvable:$true] %s47_s7 }
   0xa   :  { %53 = dma.hbm_to_vmem [thread:$0]  %s46_s1, 2048, %s48_s7, [#allocation6], %s323_s26, %s323_s26, %s324_s27  }
   0xb   :  { %316 = dma.done.wait [#allocation3], 256  }
   0xc   :  { %317 = vsyncadd [#allocation3], 4294967040 }
   0xd   :  { %318 = dma.done.wait [#allocation6], 4096  }
   0xe   :  { %319 = vsyncadd [#allocation6], 4294963200  ;;  %v85_v0 = vld [vmem:[#allocation5 + $0x78] sm:$0xff]  ;;  %v84_v1 = vld [vmem:[#allocation5 + $0x70] sm:$0xff]  ;;  %s327_s11 = smov [#allocation8]  }
   0xf   :  { %180 = vmatpush.msra.mxu2 %v85_v0  ;;  %90 = vmatpush.msra.mxu0 %v85_v0  ;;  %v83_v2 = vld [vmem:[#allocation5 + $0x68] sm:$0xff]  ;;  %v82_v3 = vld [vmem:[#allocation5 + $0x60] sm:$0xff]  ;;  %v81_v4 = vld [vmem:[#allocation5 + $0x58] sm:$0xff]  ;;  %s164_s12 = sshll.u32 %s327_s11, 4  ;;  %s165_s12 = int_to_ptr.vmem [resolvable:$true] %s164_s12 }
  0x10   :  { %v130_v5 = vld [vmem:[#allocation7 + $0x78] sm:$0xff]  ;;  %v129_v6 = vld [vmem:[#allocation7 + $0x70] sm:$0xff]  ;;  %v128_v8 = vld [vmem:[#allocation7 + $0x68] sm:$0xff] }
  0x11   :  { %181 = vmatpush.msra.mxu2 %v84_v1  ;;  %91 = vmatpush.msra.mxu0 %v84_v1  ;;  %v80_v7 = vld [vmem:[#allocation5 + $0x50] sm:$0xff]  ;;  %v79_v9 = vld [vmem:[#allocation5 + $0x48] sm:$0xff]  ;;  %v127_v10 = vld [vmem:[#allocation7 + $0x60] sm:$0xff] }
  0x12   :  { %196 = vmatpush.msra.mxu3 %v130_v5  ;;  %135 = vmatpush.msra.mxu1 %v130_v5  ;;  %v78_v11 = vld [vmem:[#allocation5 + $0x40] sm:$0xff]  ;;  %v126_v12 = vld [vmem:[#allocation7 + $0x58] sm:$0xff]  ;;  %v125_v14 = vld [vmem:[#allocation7 + $0x50] sm:$0xff] }
  0x13   :  { %182 = vmatpush.msra.mxu2 %v83_v2  ;;  %92 = vmatpush.msra.mxu0 %v83_v2  ;;  %v77_v13 = vld [vmem:[#allocation5 + $0x38] sm:$0xff]  ;;  %v76_v15 = vld [vmem:[#allocation5 + $0x30] sm:$0xff]  ;;  %v124_v16 = vld [vmem:[#allocation7 + $0x48] sm:$0xff] }
  0x14   :  { %197 = vmatpush.msra.mxu3 %v129_v6  ;;  %136 = vmatpush.msra.mxu1 %v129_v6  ;;  %v75_v17 = vld [vmem:[#allocation5 + $0x28] sm:$0xff]  ;;  %v123_v18 = vld [vmem:[#allocation7 + $0x40] sm:$0xff]  ;;  %v122_v20 = vld [vmem:[#allocation7 + $0x38] sm:$0xff] }
  0x15   :  { %183 = vmatpush.msra.mxu2 %v82_v3  ;;  %93 = vmatpush.msra.mxu0 %v82_v3  ;;  %v74_v19 = vld [vmem:[#allocation5 + $0x20] sm:$0xff]  ;;  %v73_v21 = vld [vmem:[#allocation5 + $0x18] sm:$0xff]  ;;  %v121_v22 = vld [vmem:[#allocation7 + $0x30] sm:$0xff] }
  0x16   :  { %198 = vmatpush.msra.mxu3 %v128_v8  ;;  %137 = vmatpush.msra.mxu1 %v128_v8  ;;  %v72_v23 = vld [vmem:[#allocation5 + $0x10] sm:$0xff]  ;;  %v120_v24 = vld [vmem:[#allocation7 + $0x28] sm:$0xff]  ;;  %v119_v26 = vld [vmem:[#allocation7 + $0x20] sm:$0xff] }
  0x17   :  { %184 = vmatpush.msra.mxu2 %v81_v4  ;;  %94 = vmatpush.msra.mxu0 %v81_v4  ;;  %v71_v25 = vld [vmem:[#allocation5 + $0x8] sm:$0xff]  ;;  %v70_v27 = vld [vmem:[#allocation5] sm:$0xff]  ;;  %v69_v28 = vld [vmem:[#allocation2 + $0x8] sm:$0xff] }
  0x18   :  { %199 = vmatpush.msra.mxu3 %v127_v10  ;;  %138 = vmatpush.msra.mxu1 %v127_v10  ;;  %v68_v29 = vld [vmem:[#allocation2] sm:$0xff]  ;;  %v118_v30 = vld [vmem:[#allocation7 + $0x18] sm:$0xff]  ;;  %v116_v32 = vld [vmem:[#allocation7 + $0x8] sm:$0xff] }
  0x19   :  { %185 = vmatpush.msra.mxu2 %v80_v7  ;;  %95 = vmatpush.msra.mxu0 %v80_v7  ;;  %v117_v31 = vld [vmem:[#allocation7 + $0x10] sm:$0xff]  ;;  %v115_v33 = vld [vmem:[#allocation7] sm:$0xff] }
  0x1a   :  { %200 = vmatpush.msra.mxu3 %v126_v12  ;;  %139 = vmatpush.msra.mxu1 %v126_v12  ;;  %v218_v34 = vld [vmem:[%s390_s2] ss:$0 sm:$0xff]  ;;  %s166_s2 = sshll.u32 %s393_s5, 4  ;;  %s167_s2 = int_to_ptr.hbm [resolvable:$true] %s166_s2 }
  0x1b   :  { %186 = vmatpush.msra.mxu2 %v79_v9  ;;  %96 = vmatpush.msra.mxu0 %v79_v9  ;;  %v219_v41 = vld [vmem:[%s392_s4] ss:$0 sm:$0xff] }
  0x1c   :  { %201 = vmatpush.msra.mxu3 %v125_v14  ;;  %140 = vmatpush.msra.mxu1 %v125_v14 }
  0x1d   :  { %187 = vmatpush.msra.mxu2 %v78_v11  ;;  %97 = vmatpush.msra.mxu0 %v78_v11 }
  0x1e   :  { %202 = vmatpush.msra.mxu3 %v124_v16  ;;  %141 = vmatpush.msra.mxu1 %v124_v16 }
  0x1f   :  { %188 = vmatpush.msra.mxu2 %v77_v13  ;;  %98 = vmatpush.msra.mxu0 %v77_v13 }
  0x20   :  { %203 = vmatpush.msra.mxu3 %v123_v18  ;;  %142 = vmatpush.msra.mxu1 %v123_v18 }
  0x21   :  { %189 = vmatpush.msra.mxu2 %v76_v15  ;;  %99 = vmatpush.msra.mxu0 %v76_v15 }
  0x22   :  { %204 = vmatpush.msra.mxu3 %v122_v20  ;;  %143 = vmatpush.msra.mxu1 %v122_v20 }
  0x23   :  { %190 = vmatpush.msra.mxu2 %v75_v17  ;;  %100 = vmatpush.msra.mxu0 %v75_v17 }
  0x24   :  { %205 = vmatpush.msra.mxu3 %v121_v22  ;;  %144 = vmatpush.msra.mxu1 %v121_v22 }
  0x25   :  { %191 = vmatpush.msra.mxu2 %v74_v19  ;;  %101 = vmatpush.msra.mxu0 %v74_v19 }
  0x26   :  { %206 = vmatpush.msra.mxu3 %v120_v24  ;;  %145 = vmatpush.msra.mxu1 %v120_v24 }
  0x27   :  { %192 = vmatpush.msra.mxu2 %v73_v21  ;;  %102 = vmatpush.msra.mxu0 %v73_v21 }
  0x28   :  { %207 = vmatpush.msra.mxu3 %v119_v26  ;;  %146 = vmatpush.msra.mxu1 %v119_v26 }
  0x29   :  { %193 = vmatpush.msra.mxu2 %v72_v23  ;;  %103 = vmatpush.msra.mxu0 %v72_v23 }
  0x2a   :  { %208 = vmatpush.msra.mxu3 %v118_v30  ;;  %147 = vmatpush.msra.mxu1 %v118_v30 }
  0x2b   :  { %194 = vmatpush.msra.mxu2 %v71_v25  ;;  %104 = vmatpush.msra.mxu0 %v71_v25 }
  0x2c   :  { %209 = vmatpush.msra.mxu3 %v117_v31  ;;  %148 = vmatpush.msra.mxu1 %v117_v31 }
  0x2d   :  { %195 = vmatpush.msra.mxu2 %v70_v27  ;;  %105 = vmatpush.msra.mxu0 %v70_v27 }
  0x2e   :  { %109 = vmatmul.f32.vlgmr.msra.gmra.mxu2 %v69_v28  ;;  %106 = vmatmul.f32.vlgmr.msra.gmra.mxu0 %v68_v29 }
  0x2f   :  { %210 = vmatpush.msra.mxu3 %v116_v32  ;;  %149 = vmatpush.msra.mxu1 %v116_v32 }
  0x31   :  { %211 = vmatpush.msra.mxu3 %v115_v33  ;;  %150 = vmatpush.msra.mxu1 %v115_v33 }
  0xab   :  { %v107_v35 = vpop.f32.mrf.mxu0 }
  0xac   :  { %v108_v36 = vadd.f32 %v218_v34, %v107_v35 }
  0xae   :  { %v113_v37 = vmax.f32 %v108_v36, 0.0 }
  0xb0   :  { %151 = vmatmul.f32.vlgmr.msra.gmra.mxu1 %v113_v37 }
  0xb1   :  { %v110_v38 = vpop.f32.mrf.mxu2 }
  0xb2   :  { %v111_v39 = vadd.f32 %v218_v34, %v110_v38 }
  0xb4   :  { %v114_v40 = vmax.f32 %v111_v39, 0.0 }
  0xb6   :  { %154 = vmatmul.f32.vlgmr.msra.gmra.mxu3 %v114_v40 }
 0x12d   :  { %v152_v42 = vpop.f32.mrf.mxu1 }
 0x12e   :  { %v153_v43 = vadd.f32 %v219_v41, %v152_v42 }
 0x130   :  { %158 = vst [vmem:[#allocation8] sm:$0xff] %v153_v43 }
 0x139   :  { %v155_v44 = vpop.f32.mrf.mxu3 }
 0x13a   :  { %v156_v45 = vadd.f32 %v219_v41, %v155_v44 }
 0x13c   :  { %159 = vst [vmem:[#allocation8 + $0x8] sm:$0xff] %v156_v45 }
 0x13d   :  { %172 = dma.vmem_to_hbm [thread:$0]  %s165_s12, 256, %s167_s2, [#allocation4], %s323_s26, %s323_s26, %s324_s27  }
 0x13e   :  { %320 = dma.done.wait [#allocation4], 256  }
 0x13f   :  { %321 = vsyncadd [#allocation4], 4294967040 }
 0x140   :  { %177 = vsyncpa [#allocation3], 1 }
 0x141   :  { %178 = vsyncpa [#allocation6], 1 }
 0x142   :  { %179 = vsyncpa [#allocation4], 1 }

</bundles_post_ra>
